<compile_context>
chip_gen: v7x
topology: tpu7x:2x2x1
jax: 0.10.0
libtpu: 0.0.40
codegen_flags: <defaults>
</compile_context>

<pallas_src>
import jax
import jax.numpy as jnp
from jax.experimental import pallas as pl
from jax.experimental.pallas import tpu as pltpu


def pool_linear_kernel(x_ref, w_ref, y_ref):
    # x_ref: (tn, C, HW) native dtype (HW on the 128-lane axis)
    # w_ref: (C, OUT)    f32, pre-scaled by 1/(H*W)
    # y_ref: (tn, 1, OUT) f32
    pooled = jnp.sum(x_ref[...].astype(jnp.float32), axis=-1)            # (tn, C): lane reduce (XLU)
    y = jnp.dot(pooled, w_ref[...], preferred_element_type=jnp.float32)  # (tn, OUT): tiny MXU epilogue
    y_ref[...] = y[:, None, :].astype(y_ref.dtype)


def _pick_tile_n(n, c, hw, x_elem_bytes, out_dim,
                 x_budget_bytes=8 << 20, buffers=2):
    """N-tile size from a *real* VMEM footprint model.

    Accounts for (a) padding of the minor (C, HW) dims to (8, 128) vreg tiles,
    (b) the `buffers`-deep pipelining of the x input and y output, and
    (c) the f32 pooled intermediate -- the items flagged by the perf review.
    """
    pad8 = lambda v: -(-v // 8) * 8
    pad128 = lambda v: -(-v // 128) * 128
    c_pad, hw_pad, out_pad = pad8(c), pad128(hw), pad128(out_dim)
    per_row = (buffers * c_pad * hw_pad * x_elem_bytes   # pipelined x tile
               + pad128(c) * 4                           # f32 pooled row (vregs / scratch)
               + buffers * out_pad * 4)                  # pipelined f32 output tile
    tn = max(1, x_budget_bytes // per_row)
    # Keep at least min(N, 8) grid steps: DMA/compute overlap + both v7x TCs busy.
    tn = min(tn, n, max(1, pl.cdiv(n, min(n, 8))))
    return int(tn)


def bbox_regressor(x_nchw, w_t, bias, gamma, beta):
    """x_nchw: (N, C, H, W); w_t: (C, 4*num_classes) = Linear.weight.T;
    bias/gamma/beta: (4*num_classes,)."""
    N, C, H, W = x_nchw.shape
    HW = H * W
    out_dim = w_t.shape[1]

    # Free reshape (NCHW is contiguous as (N, C, HW)); no transpose pass.
    x_flat = x_nchw.reshape(N, C, HW)

    # Fold the 1/(H*W) pooling scale into the tiny weight at trace time.
    w_scaled = w_t.astype(jnp.float32) * (1.0 / HW)

    tn = _pick_tile_n(N, C, HW, x_flat.dtype.itemsize, out_dim)
    grid = (pl.cdiv(N, tn),)

    cost = pl.CostEstimate(
        flops=N * C * HW + 2 * N * C * out_dim,
        transcendentals=0,
        bytes_accessed=(x_flat.size * x_flat.dtype.itemsize
                        + w_scaled.size * 4 + N * out_dim * 4),
    )

    # Pooled Linear: gridded + double-buffered over N, "parallel" (megacore).
    y3 = pl.pallas_call(
        pool_linear_kernel,
        out_shape=jax.ShapeDtypeStruct((N, 1, out_dim), jnp.float32),
        grid=grid,
        in_specs=[
            pl.BlockSpec((tn, C, HW), lambda i: (i, 0, 0)),
            pl.BlockSpec((C, out_dim), lambda i: (0, 0)),
        ],
        out_specs=pl.BlockSpec((tn, 1, out_dim), lambda i: (i, 0, 0)),
        compiler_params=pltpu.CompilerParams(
            dimension_semantics=("parallel",),
            vmem_limit_bytes=32 << 20),
        cost_estimate=cost,
    )(x_flat, w_scaled)

    # Linear bias (a per-column constant -- exactly cancelled by BN's mean
    # subtraction, kept only for semantic fidelity to nn.Linear).
    y = y3.reshape(N, out_dim) + bias.astype(jnp.float32)

    # BatchNorm1d, training-mode batch statistics (biased variance, eps=1e-5).
    # (N, 8) is microseconds of VPU work -> plain jnp, fused by XLA (per perf
    # review; a dedicated pallas_call only adds dispatch + HBM round trip).
    # TODO(synk): PyTorch training-mode BN also updates running_mean /
    # running_var buffers as a side effect; only the forward output is emitted.
    mu = jnp.mean(y, axis=0, keepdims=True)
    var = jnp.mean(jnp.square(y - mu), axis=0, keepdims=True)
    inv_std = jax.lax.rsqrt(var + 1e-5)
    return gamma.astype(jnp.float32) * (y - mu) * inv_std + beta.astype(jnp.float32)


def reference(x_nchw, w_t, bias, gamma, beta):
    pooled = jnp.mean(x_nchw.astype(jnp.float32), axis=(2, 3))
    y = pooled @ w_t.astype(jnp.float32) + bias
    mu = jnp.mean(y, axis=0, keepdims=True)
    var = jnp.mean((y - mu) ** 2, axis=0, keepdims=True)
    return gamma * (y - mu) / jnp.sqrt(var + 1e-5) + beta


if __name__ == "__main__":
    key = jax.random.PRNGKey(0)
    k_x, k_w, k_g = jax.random.split(key, 3)

    N, C, H, W = 2, 4, 16, 16          # in_channels=4, num_classes=2 -> out=8
    num_classes = 2
    out_dim = 4 * num_classes

    x = jax.random.normal(k_x, (N, C, H, W), dtype=jnp.float32)

    # Deterministic parameter init mirroring the module's __init__:
    #   Linear.weight ~ N(0, 0.01), Linear.bias = 0
    #   BN.weight ~ N(0, 0.01),     BN.bias = 0
    w = 0.01 * jax.random.normal(k_w, (out_dim, C), dtype=jnp.float32)  # (8, C)
    w_t = w.T                                                           # (C, 8)
    bias = jnp.zeros((out_dim,), dtype=jnp.float32)
    gamma = 0.01 * jax.random.normal(k_g, (out_dim,), dtype=jnp.float32)
    beta = jnp.zeros((out_dim,), dtype=jnp.float32)

    out = bbox_regressor(x, w_t, bias, gamma, beta)
    jax.block_until_ready(out)

    ref = reference(x, w_t, bias, gamma, beta)
    assert out.shape == (N, out_dim)
    assert jnp.allclose(out, ref, atol=1e-4, rtol=1e-4), (out, ref)

    print("KERNEL_OK")
</pallas_src>

<mosaic_0001>
module attributes {stable_mosaic.version = 11 : i64} {
  func.func @pool_linear_kernel(%arg0: i32, %arg1: memref<1x4x256xf32, #tpu.memory_space<vmem>>, %arg2: memref<4x8xf32, #tpu.memory_space<vmem>>, %arg3: memref<1x1x8xf32, #tpu.memory_space<vmem>>) attributes {dimension_semantics = [#tpu.dimension_semantics<parallel>], iteration_bounds = array<i64: 2>, scalar_prefetch = 0 : i64, scratch_operands = 0 : i64, tpu.core_type = #tpu.core_type<tc>, window_params = [{transform_indices = @transform_0, window_bounds = array<i64: 1, 4, 256>}, {pipeline_mode = #tpu.pipeline_mode<synchronous>, transform_indices = @transform_1, window_bounds = array<i64: 4, 8>}, {transform_indices = @transform_2, window_bounds = array<i64: 1, 1, 8>}]} {
    %c0 = arith.constant 0 : index
    %c0_0 = arith.constant 0 : index
    %c0_1 = arith.constant 0 : index
    %0 = vector.load %arg1[%c0, %c0_0, %c0_1] : memref<1x4x256xf32, #tpu.memory_space<vmem>>, vector<1x4x256xf32>
    %cst = arith.constant dense<0.000000e+00> : vector<1x4xf32>
    %1 = vector.multi_reduction <add>, %0, %cst [2] : vector<1x4x256xf32> to vector<1x4xf32>
    %c0_2 = arith.constant 0 : index
    %c0_3 = arith.constant 0 : index
    %2 = vector.load %arg2[%c0_2, %c0_3] : memref<4x8xf32, #tpu.memory_space<vmem>>, vector<4x8xf32>
    %cst_4 = arith.constant dense<0.000000e+00> : vector<1x8xf32>
    %3 = tpu.matmul %1, %2, %cst_4 {dimension_numbers = #tpu.dot_dimension_numbers<[1], [0], [0], [1], [0, 0, 1, 1], [], []>} : vector<1x4xf32>, vector<4x8xf32>, vector<1x8xf32> -> vector<1x8xf32>
    %4 = vector.shape_cast %3 : vector<1x8xf32> to vector<1x1x8xf32>
    %c0_5 = arith.constant 0 : index
    %c0_6 = arith.constant 0 : index
    %c0_7 = arith.constant 0 : index
    %5 = vector.load %arg3[%c0_5, %c0_6, %c0_7] : memref<1x1x8xf32, #tpu.memory_space<vmem>>, vector<1x1x8xf32>
    tpu.vector_store %arg3[%c0_5, %c0_6, %c0_7], %4 {strides = array<i32>} : memref<1x1x8xf32, #tpu.memory_space<vmem>>, vector<1x1x8xf32>,
    return
  }
  func.func @transform_0(%arg0: i32) -> (i32, i32, i32) {
    %c0_i32 = arith.constant 0 : i32
    %c0_i32_0 = arith.constant 0 : i32
    %c0_i32_1 = arith.constant 0 : i32
    return %arg0, %c0_i32, %c0_i32_0 : i32, i32, i32
  }
  func.func @transform_1(%arg0: i32) -> (i32, i32) {
    %c0_i32 = arith.constant 0 : i32
    %c0_i32_0 = arith.constant 0 : i32
    %c0_i32_1 = arith.constant 0 : i32
    return %c0_i32, %c0_i32_0 : i32, i32
  }
  func.func @transform_2(%arg0: i32) -> (i32, i32, i32) {
    %c0_i32 = arith.constant 0 : i32
    %c0_i32_0 = arith.constant 0 : i32
    %c0_i32_1 = arith.constant 0 : i32
    return %arg0, %c0_i32, %c0_i32_0 : i32, i32, i32
  }
}

</mosaic_0001>

<bundles_post_ra>
// kernel: tpu_custom_call.1
= control target key start
LH: loop header
LB: loop body
LE: loop exit
PB: predicated region body
PF: predicated region fallthrough
CT: control target
= control target key end

     0   :  { %7 = vsyncpa [#allocation3], 0  ;;  %s792_s0 = inlined_call_operand.hbm [shape: f32[2,4,256], index: 0, kind: input, shape index: {}]   ;;  %s793_s1 = inlined_call_operand.hbm [shape: f32[4,8], index: 1, kind: input, shape index: {}]   ;;  %s794_s2 = inlined_call_operand.hbm [shape: f32[2,1,8], index: 2, kind: output, shape index: {}]  }
   0x1   :  { %9 = vsyncpa [#allocation3 + $0x1], 0 }
   0x2   :  { %10 = vsyncpa [#allocation6], 0 }
   0x3   :  { %11 = vsyncpa [#allocation4], 0 }
   0x4   :  { %13 = vsyncpa [#allocation4 + $0x1], 0  ;;  %s590_s9 = smov 0   ;;  %s592_s10 = smov 0  }
   0x5   :  { %s594_s11 = smov 0   ;;  %s596_s12 = smov 0  }
   0x6 LB: > { %s611_s13 = sadd.s32 4294967295, %s568_s12   ;;  %s357_s14 = sadd.s32 4294967294, %s568_s12   ;;  %s568_s12 = sphi %s596_s12, %s818_s12   ;;  %s564_s11 = sphi %s594_s11, %s817_s11   ;;  %s560_s10 = sphi %s592_s10, %s816_s10   ;;  %s556_s9 = sphi %s590_s9, %s815_s9  }
   0x7   : > { %p39_p0 = scmp.ne.s32.totalorder %s560_s10, %s556_s9  ;;  %p795_p1 = scmp.eq.s32.totalorder %s611_s13, 0 }
   0x8   : > { %p90_p3 = scmp.eq.s32.totalorder %s357_s14, 1  ;;  %p358_p5 = scmp.ge.s32.totalorder %s568_s12, 1 }
   0x9   : > { %p620_p4 = por %p795_p1, %p39_p0  ;;  %p97_p7 = scmp.lt.s32.totalorder %s568_s12, 3 }
   0xa   : > { %p625_p6 = por %p90_p3, %p39_p0  ;;  %s570_s18 = smov [#allocation5]  }
   0xb   : > { %s798_s15 = scalar_select %p620_p4, 1, 0 }
   0xc   : > { %s799_s16 = scalar_select %p625_p6, 1, 0 }
   0xd   : > { %p630_p8 = pnand %p358_p5, %p97_p7  ;;  %s110_s19 = sshll.u32 %s570_s18, 4  ;;  %s111_s19 = int_to_ptr.vmem [resolvable:$true] %s110_s19 }
   0xe   : > { %s638_s20 = sadd.s32 1, %s568_s12   ;;  %s26_s24 = sadd.s32 1, %s564_s11 }
   0xf   : > { %s800_s17 = scalar_select %p630_p8, 1, 0 }
  0x10   : > { %p388_p10 = pneg %p630_p8  ;;  %s23_s22 = ssub.s32 %s568_s12, %s638_s20 }
  0x11   : > { %p648_p12 = scmp.eq.s32.totalorder %s23_s22, 0  ;;  %s440_s27 = scalar_lea.hbm %s793_s1, 64 }
  0x12   : > { %p642_p11 = pnand %p388_p10, %p795_p1  ;;  %p441_p0 = scmp.ne.s32.totalorder %s793_s1, %s440_s27 }
  0x13   : > { %s802_s23 = scalar_select %p648_p12, 1, 0 }
  0x14   : > { %p442_p3 = pneg %p642_p11  ;;  %p447_p10 = scmp.lt.u32.totalorder %s440_s27, %s793_s1 }
  0x16   : > { %p443_p5 = pnand %p442_p3, %p441_p0 }
  0x18   : > { %p444_p7 = pneg %p443_p5 }
  0x1a   : > { %p449_p9 = pnand %p447_p10, %p444_p7 }
  0x1c   : > { %452 = shalt.err (!%p449_p9)
}
  0x1d   : > { %s453_s4 = scalar_lea.vmem %s111_s19, 64  ;;  %p461_p6 = scmp.lt.s32.totalorder %s111_s19, %s111_s19 }
  0x1e   : > { %p454_p1 = scmp.ne.s32.totalorder %s111_s19, %s453_s4  ;;  %p462_p4 = scmp.lt.s32.totalorder %s453_s4, %s453_s4 }
  0x20   : > { %p456_p2 = pnand %p454_p1, %p442_p3  ;;  %p463_p8 = por %p462_p4, %p461_p6 }
  0x22   : > { %p457_p13 = pneg %p456_p2 }
  0x24   : > { %p464_p12 = pnand %p463_p8, %p457_p13 }
  0x26   : > { %467 = shalt.err (!%p464_p12)
}
  0x27   : > { %391 = dma.hbm_to_vmem [thread:$0]  (!%p642_p11), %s793_s1, 64, %s111_s19, [#allocation6]  }
  0x28   : > { %p803_p1 = scmp.ne.s32.totalorder %s802_s23, 0  ;;  %p34_p2 = scmp.eq.s32.totalorder %s568_s12, 0 }
  0x29   : > { %p804_p4 = scmp.ne.s32.totalorder %s564_s11, %s560_s10  ;;  %p805_p6 = scmp.eq.s32.totalorder %s611_s13, 1 }
  0x2a   : > { %s674_s7 = scalar_select %p803_p1, %s564_s11, %s26_s24  }
  0x2b   : > { %p682_p8 = por %p805_p6, %p804_p4  ;;  %p401_p9 = scmp.lt.s32.totalorder %s568_s12, 2 }
  0x2c   : > { %s121_s14 = sand.u32 1, %s564_s11   ;;  %p807_p12 = pmov %p804_p4 }
  0x2d   : > { %s361_s18 = sshll.u32 %s121_s14, 3  ;;  %s372_s21 = sshll.u32 %s568_s12, 7 }
  0x2e   : > { %p35_p13 = por %p34_p2, %p807_p12  ;;  %s695_s19 = scalar_lea.hbm %s792_s0, %s372_s21 }
  0x2f   : > { %s125_s23 = scalar_lea.vmem [#allocation2], %s361_s18  ;;  %s122_s27 = scalar_lea.sflag [#allocation3], %s121_s14 }
  0x30   : > { %s133_s24 = sshll.u32 %s125_s23, 4  ;;  %p697_p11 = pnand %p401_p9, %p35_p13  ;;  %s701_s24 = int_to_ptr.vmem [resolvable:$true] %s133_s24 }
  0x31   : > { %s468_s28 = scalar_lea.hbm %s695_s19, 128  ;;  %s473_s3 = scalar_lea.hbm %s792_s0, 256 }
  0x32   : > { %p469_p0 = scmp.ne.s32.totalorder %s695_s19, %s468_s28  ;;  %p470_p3 = pneg %p697_p11 }
  0x33   : > { %p474_p10 = scmp.lt.u32.totalorder %s695_s19, %s792_s0  ;;  %p475_p1 = scmp.lt.u32.totalorder %s473_s3, %s468_s28 }
  0x34   : > { %p471_p5 = pnand %p470_p3, %p469_p0  ;;  %p477_p4 = scmp.lt.u32.totalorder %s468_s28, %s695_s19 }
  0x35   : > { %p476_p2 = por %p475_p1, %p474_p10 }
  0x36   : > { %p472_p7 = pneg %p471_p5 }
  0x37   : > { %p478_p6 = por %p477_p4, %p476_p2 }
  0x39   : > { %p479_p9 = pnand %p478_p6, %p472_p7 }
  0x3b   : > { %482 = shalt.err (!%p479_p9)
}
  0x3c   : > { %s483_s6 = scalar_lea.vmem %s701_s24, 128  ;;  %s571_s14 = smov [#allocation2]  }
  0x3d   : > { %p484_p12 = scmp.ne.s32.totalorder %s701_s24, %s483_s6  ;;  %s488_s18 = sshll.u32 %s571_s14, 4  ;;  %s489_s18 = int_to_ptr.vmem [resolvable:$false] %s488_s18 }
  0x3e   : > { %s490_s21 = scalar_lea.vmem %s489_s18, 256  ;;  %p491_p5 = scmp.lt.s32.totalorder %s701_s24, %s489_s18 }
  0x3f   : > { %p486_p13 = pnand %p484_p12, %p470_p3  ;;  %p492_p10 = scmp.lt.s32.totalorder %s490_s21, %s483_s6 }
  0x41   : > { %p487_p0 = pneg %p486_p13  ;;  %p493_p1 = por %p492_p10, %p491_p5 }
  0x43   : > { %p494_p2 = pnand %p493_p1, %p487_p0 }
  0x45   : > { %497 = shalt.err (!%p494_p2)
}
  0x46   : > { %395 = dma.hbm_to_vmem [thread:$0]  (!%p697_p11), %s695_s19, 128, %s701_s24, %s122_s27  }
  0x47   : > { %p809_p7 = scmp.ne.s32.totalorder %s800_s17, 0 }
  0x48   : > { %s731_s22 = sand.u32 (!%p809_p7), 1, %s560_s10   ;;  %p810_p3 = scmp.ne.s32.totalorder (!%p809_p7), %s798_s15, 0 }
  0x49   : > { %142 = sbr.rel (%p809_p7) target bundleno = 460 (0x1cc), region = 28  ;;  %s365_s25 = sshll.u32 (!%p809_p7), %s731_s22, 3 }
  0x4a   : > { %s145_s23 = scalar_lea.sflag (!%p809_p7), [#allocation3], %s731_s22  ;;  %s148_s28 = scalar_lea.vmem (!%p809_p7), [#allocation2], %s365_s25 }
  0x50   : > { %543 = dma.done.wait (%p810_p3), %s145_s23, 128  }
  0x51   : > { %545 = vsyncadd (%p810_p3), %s145_s23, 4294967168  ;;  %p811_p4 = scmp.eq.s32.totalorder %s611_s13, 0 }
  0x53   : > { %547 = dma.done.wait (%p811_p4), [#allocation6], 64   ;;  %p812_p11 = pmov %p811_p4 }
  0x54   : > { %vm176_vm0 = vcmask 1043456   ;;  %v172_v0 = vld [vmem:[%s148_s28] sm:$0xff]  ;;  %v572_v5 = vmov 0.0   ;;  %v182_v6 = vld [vmem:[#allocation5] sm:$0xf]  ;;  %vm573_vm1 = vmmov 0   ;;  %v184_v7 = vlaneseq }
  0x55   : > { %549 = vsyncadd (%p812_p11), [#allocation6], 4294967232  ;;  %v174_v1 = vcombine.high %v172_v0, %v172_v0  ;;  %v177_v2 = vsel %vm176_vm0, %v172_v0, 0.0  ;;  %375 = vmatprep.subr.mxu0 %v572_v5  ;;  %377 = vmatprep.mubr.msk.f32.mxu0 %vm573_vm1, %v572_v5  ;;  %vm190_vm2 = vcmask 31744   ;;  %s369_s15 = sshll.u32 %s611_s13, 4  ;;  %s171_s17 = scalar_lea.vmem [#allocation7], %s731_s22 }
  0x56   : > { %376 = vmatpush3.msk.msra.mxu0 %vm176_vm0, %v182_v6  ;;  %v185_v8 = vand.u32 127, %v184_v7  ;;  %v187_v9 = vshrl.u32 %v184_v7, 7  ;;  %s281_s19 = sshll.u32 %s171_s17, 4  ;;  %vm266_vm3 = vcmask 57344   ;;  %s748_s27 = scalar_lea.hbm %s794_s2, %s369_s15  ;;  %s750_s19 = int_to_ptr.vmem [resolvable:$true] %s281_s19 }
  0x57   : > { %v178_v3 = vsel %vm176_vm0, %v174_v1, 0.0  ;;  %s269_s29 = scalar_lea.sflag [#allocation4], %s731_s22  ;;  %s498_s30 = scalar_lea.vmem %s750_s19, 16 }
  0x58   : > { %v179_v4 = vadd.f32 %v178_v3, %v177_v2  ;;  %v188_v10 = vsub.s32 %v185_v8, %v187_v9  ;;  %p499_p6 = scmp.ne.s32.totalorder %s750_s19, %s498_s30  ;;  %s574_s13 = smov [#allocation7]  }
  0x59   : > { %s502_s3 = sshll.u32 %s574_s13, 4  ;;  %s503_s3 = int_to_ptr.vmem [resolvable:$false] %s502_s3 }
  0x5a   : > { %180 = vadd.xlane.f32.xlu0 %v179_v4  ;;  %p500_p9 = pnand %p499_p6, %p682_p8  ;;  %s504_s4 = scalar_lea.vmem %s503_s3, 32 }
  0x5b   : > { %p505_p13 = scmp.lt.s32.totalorder %s750_s19, %s503_s3  ;;  %p506_p0 = scmp.lt.s32.totalorder %s504_s4, %s498_s30 }
  0x5c   : > { %p501_p12 = pneg %p500_p9 }
  0x5d   : > { %p507_p5 = por %p506_p0, %p505_p13 }
  0x5f   : > { %p508_p10 = pnand %p507_p5, %p501_p12 }
  0xe7   : > { %v181_v11 = vpop.xlane.xlu0 %180 }
  0xe8   : > { %v189_v12 = vrot.slane %v181_v11, %v188_v10 }
  0xea   : > { %378 = vmatmul.mubr.msk.f32.vlgmr.msra.gmra.mrb[0].mxu0 %vm190_vm2, %v189_v12 }
 0x1bd   : > { %v262_v13 = vpop.f32.mrb[0].mxu0 }
 0x1be   : > { %267 = vst.msk [vmem:[%s171_s17] sm:$0x1] %vm266_vm3, %v262_v13  ;;  %v379_v14 = vpop.f32.mrb[1].mxu0 }
 0x1bf   : > { %511 = shalt.err (!%p508_p10)
}
 0x1c0   : > { %s512_s5 = scalar_lea.hbm %s748_s27, 16  ;;  %s516_s18 = scalar_lea.hbm %s794_s2, 32 }
 0x1c1   : > { %p513_p1 = scmp.ne.s32.totalorder %s748_s27, %s512_s5  ;;  %p517_p3 = scmp.lt.u32.totalorder %s748_s27, %s794_s2 }
 0x1c2   : > { %p518_p4 = scmp.lt.u32.totalorder %s516_s18, %s512_s5  ;;  %p520_p6 = scmp.lt.u32.totalorder %s512_s5, %s748_s27 }
 0x1c3   : > { %p514_p2 = pnand %p513_p1, %p682_p8 }
 0x1c4   : > { %p519_p11 = por %p518_p4, %p517_p3 }
 0x1c5   : > { %p515_p7 = pneg %p514_p2 }
 0x1c6   : > { %p521_p9 = por %p520_p6, %p519_p11 }
 0x1c8   : > { %p522_p12 = pnand %p521_p9, %p515_p7 }
 0x1ca   : > { %525 = shalt.err (!%p522_p12)
}
 0x1cb   : > { %386 = dma.vmem_to_hbm [thread:$0]  (%p682_p8), %s750_s19, 16, %s748_s27, %s269_s29  }
 0x1cc PF: > { %s293_s25 = sand.u32 1, %s556_s9   ;;  %p813_p13 = scmp.ne.s32.totalorder %s799_s16, 0 }
 0x1cd   : > { %p814_p0 = scmp.ge.s32.totalorder %s568_s12, 2  ;;  %s294_s23 = scalar_lea.sflag [#allocation4], %s293_s25 }
 0x1cf   : > { %p397_p5 = pnand %p814_p0, %p813_p13 }
 0x1d1   : > { %551 = dma.done.wait (!%p397_p5), %s294_s23, 16  }
 0x1d2   : > { %553 = vsyncadd (!%p397_p5), %s294_s23, 4294967280  ;;  %p16_p10 = scmp.ge.s32.totalorder %s638_s20, 4   ;;  %s815_s9 = smov %s560_s10 }
 0x1d3   : > { %s816_s10 = smov %s564_s11  ;;  %s817_s11 = smov %s674_s7 }
 0x1d4   : > { %s818_s12 = smov %s638_s20  ;;  %18 = sbr.rel (!%p16_p10) target bundleno = 6 (0x6), region = 77 }
 0x1db   :  { %298 = vsyncpa [#allocation3], 1 }
 0x1dc   :  { %300 = vsyncpa [#allocation3 + $0x1], 1 }
 0x1dd   :  { %301 = vsyncpa [#allocation6], 1 }
 0x1de   :  { %302 = vsyncpa [#allocation4], 1 }
 0x1df   :  { %304 = vsyncpa [#allocation4 + $0x1], 1 }

</bundles_post_ra>
